<compile_context>
chip_gen: v7x
topology: tpu7x:2x2x1
jax: 0.10.0
libtpu: 0.0.40
codegen_flags: <defaults>
</compile_context>

<pallas_src>
import jax
import jax.numpy as jnp
from jax.experimental import pallas as pl
from jax.experimental.pallas import tpu as pltpu

LN_EPS = 1e-5
H1, H2 = 512, 256


def _layernorm_relu(h, gamma, beta):
    """One-pass LayerNorm (gamma folded into the scale) followed by ReLU."""
    inv_n = 1.0 / h.shape[-1]
    mean = jnp.sum(h, axis=-1, keepdims=True) * inv_n
    msq = jnp.sum(h * h, axis=-1, keepdims=True) * inv_n
    var = msq - mean * mean
    scale = gamma * jax.lax.rsqrt(var + LN_EPS)
    return jnp.maximum((h - mean) * scale + beta, 0.0)


def critic_kernel(x_ref, y_ref,
                  w1_ref, p1_ref,
                  w2_ref, p2_ref,
                  w3_ref, b3_ref,
                  out_ref,
                  xy_scratch):
    sd = x_ref.shape[-1]
    ad = y_ref.shape[-1]

    # Pack x | y into one VMEM tile so layer 1 is a single MXU pass (K = sd+ad).
    xy_scratch[:, 0:sd] = x_ref[...]
    xy_scratch[:, sd:sd + ad] = y_ref[...]

    # ---- Layer 1: Linear(state+action -> 512) in f32 + LayerNorm + ReLU ----
    h1 = jnp.dot(xy_scratch[...], w1_ref[...],
                 preferred_element_type=jnp.float32)
    h1 = h1 + p1_ref[0:1, :]
    h1 = _layernorm_relu(h1, p1_ref[1:2, :], p1_ref[2:3, :])

    # ---- Layer 2: Linear(512 -> 256), bf16 MXU operands, f32 accumulation ----
    h2 = jnp.dot(h1.astype(jnp.bfloat16), w2_ref[...],
                 preferred_element_type=jnp.float32)
    h2 = h2 + p2_ref[0:1, :]
    h2 = _layernorm_relu(h2, p2_ref[1:2, :], p2_ref[2:3, :])

    # ---- Layer 3: Linear(256 -> 1) as an N=1 MXU dot -> (tb, 1) directly ----
    out_ref[...] = (jnp.dot(h2, w3_ref[...],
                            preferred_element_type=jnp.float32)
                    + b3_ref[...])


def _choose_tile(B, block_b):
    """Pick a batch tile; >= 2 tiles for mid/large batches (v7x: 2 TCs)."""
    if B <= 128:
        tb = max(16, ((B + 15) // 16) * 16)
    else:
        half = (B + 1) // 2
        tb = min(block_b, ((half + 127) // 128) * 128)
    b_pad = ((B + tb - 1) // tb) * tb
    return tb, b_pad


def critic_forward(x, y, params, *, block_b=512):
    """Pallas-backed Critic.forward(x, y) -> (B, 1) float32."""
    B, state_dim = x.shape
    action_dim = y.shape[-1]
    in_dim = state_dim + action_dim

    tb, b_pad = _choose_tile(B, block_b)
    if b_pad != B:
        x = jnp.pad(x, ((0, b_pad - B), (0, 0)))
        y = jnp.pad(y, ((0, b_pad - B), (0, 0)))
    num_tiles = b_pad // tb

    # Layer-1 stays f32 (tiny K); layer-2 operands are bf16 with f32 accumulate.
    w1 = params["w1"].astype(jnp.float32)                       # (in_dim, 512)
    w2 = params["w2"].astype(jnp.bfloat16)                      # (512, 256)
    w3 = params["w3"].astype(jnp.float32).reshape(H2, 1)        # (256, 1)
    p1 = jnp.concatenate([params["b1"], params["g1"], params["be1"]], axis=0)  # (3, 512)
    p2 = jnp.concatenate([params["b2"], params["g2"], params["be2"]], axis=0)  # (3, 256)

    args = (x.astype(jnp.float32), y.astype(jnp.float32),
            w1, p1, w2, p2, w3, params["b3"])

    row = lambda i: (i, 0)     # batch-tiled operands
    const = lambda i: (0, 0)   # weights / params stay resident across steps
    in_specs = [
        pl.BlockSpec((tb, state_dim), row),    # x
        pl.BlockSpec((tb, action_dim), row),   # y
        pl.BlockSpec((in_dim, H1), const),     # w1
        pl.BlockSpec((3, H1), const),          # b1 / gamma1 / beta1
        pl.BlockSpec((H1, H2), const),         # w2
        pl.BlockSpec((3, H2), const),          # b2 / gamma2 / beta2
        pl.BlockSpec((H2, 1), const),          # w3
        pl.BlockSpec((1, 1), const),           # b3
    ]

    flops = 2 * b_pad * (in_dim * H1 + H1 * H2 + H2)
    bytes_accessed = (b_pad * (state_dim + action_dim + 1) * 4
                      + w1.size * 4 + w2.size * 2 + w3.size * 4
                      + (3 * H1 + 3 * H2 + 1) * 4)

    out = pl.pallas_call(
        critic_kernel,
        out_shape=jax.ShapeDtypeStruct((b_pad, 1), jnp.float32),
        grid=(num_tiles,),
        in_specs=in_specs,
        out_specs=pl.BlockSpec((tb, 1), row),
        scratch_shapes=[pltpu.VMEM((tb, in_dim), jnp.float32)],
        compiler_params=pltpu.CompilerParams(
            dimension_semantics=("parallel",)),
        cost_estimate=pl.CostEstimate(
            flops=flops,
            transcendentals=2 * b_pad,
            bytes_accessed=bytes_accessed),
    )(*args)
    return out[:B]


def _orthogonal(key, shape):
    """Deterministic orthogonal init (same semantics as nn.init.orthogonal_)."""
    rows, cols = shape
    n = max(rows, cols)
    a = jax.random.normal(key, (n, n), dtype=jnp.float32)
    q, r = jnp.linalg.qr(a)
    q = q * jnp.sign(jnp.diag(r))[None, :]
    return q[:rows, :cols].astype(jnp.float32)


def init_critic_params(key, state_dim, action_dim):
    k1, k2, k3 = jax.random.split(key, 3)
    in_dim = state_dim + action_dim
    # Weights stored (in, out); orthogonal init, zero biases, LN gamma=1/beta=0.
    return {
        "w1": _orthogonal(k1, (in_dim, H1)),
        "b1": jnp.zeros((1, H1), jnp.float32),
        "g1": jnp.ones((1, H1), jnp.float32),
        "be1": jnp.zeros((1, H1), jnp.float32),
        "w2": _orthogonal(k2, (H1, H2)),
        "b2": jnp.zeros((1, H2), jnp.float32),
        "g2": jnp.ones((1, H2), jnp.float32),
        "be2": jnp.zeros((1, H2), jnp.float32),
        "w3": _orthogonal(k3, (H2, 1)),
        "b3": jnp.zeros((1, 1), jnp.float32),
    }


def critic_reference(x, y, p):
    """Pure-JAX reference mirroring the kernel's precision policy."""
    hi = jax.lax.Precision.HIGHEST

    def ln(h, g, b):
        m = jnp.mean(h, axis=-1, keepdims=True)
        v = jnp.mean((h - m) ** 2, axis=-1, keepdims=True)
        return (h - m) * jax.lax.rsqrt(v + LN_EPS) * g + b

    xy = jnp.concatenate([x, y], axis=-1).astype(jnp.float32)
    h = jnp.dot(xy, p["w1"], precision=hi,
                preferred_element_type=jnp.float32) + p["b1"]
    h = jnp.maximum(ln(h, p["g1"], p["be1"]), 0.0)
    h = (jnp.dot(h.astype(jnp.bfloat16), p["w2"].astype(jnp.bfloat16),
                 preferred_element_type=jnp.float32) + p["b2"])
    h = jnp.maximum(ln(h, p["g2"], p["be2"]), 0.0)
    return (jnp.dot(h, p["w3"].reshape(H2, 1), precision=hi,
                    preferred_element_type=jnp.float32) + p["b3"])


if __name__ == "__main__":
    key = jax.random.PRNGKey(0)
    k_x, k_y, k_p = jax.random.split(key, 3)

    batch, state_dim, action_dim = 2, 16, 8
    x = jax.random.normal(k_x, (batch, state_dim), dtype=jnp.float32)
    y = jax.random.normal(k_y, (batch, action_dim), dtype=jnp.float32)
    params = init_critic_params(k_p, state_dim, action_dim)

    out = jax.block_until_ready(critic_forward(x, y, params))
    ref = critic_reference(x, y, params)

    assert out.shape == (batch, 1), out.shape
    assert bool(jnp.all(jnp.isfinite(out))), out
    assert jnp.allclose(out, ref, atol=1e-2, rtol=1e-2), (out, ref)

    print("KERNEL_OK")
</pallas_src>

<mosaic_0001>
module attributes {stable_mosaic.version = 11 : i64} {
  func.func @critic_kernel(%arg0: i32, %arg1: memref<16x16xf32, #tpu.memory_space<vmem>>, %arg2: memref<16x8xf32, #tpu.memory_space<vmem>>, %arg3: memref<24x512xf32, #tpu.memory_space<vmem>>, %arg4: memref<3x512xf32, #tpu.memory_space<vmem>>, %arg5: memref<512x256xbf16, #tpu.memory_space<vmem>>, %arg6: memref<3x256xf32, #tpu.memory_space<vmem>>, %arg7: memref<256x1xf32, #tpu.memory_space<vmem>>, %arg8: memref<1x1xf32, #tpu.memory_space<vmem>>, %arg9: memref<16x1xf32, #tpu.memory_space<vmem>>, %arg10: memref<16x24xf32, #tpu.memory_space<vmem>>) attributes {dimension_semantics = [#tpu.dimension_semantics<parallel>], iteration_bounds = array<i64: 1>, scalar_prefetch = 0 : i64, scratch_operands = 1 : i64, tpu.core_type = #tpu.core_type<tc>, window_params = [{transform_indices = @transform_0, window_bounds = array<i64: 16, 16>}, {transform_indices = @transform_1, window_bounds = array<i64: 16, 8>}, {pipeline_mode = #tpu.pipeline_mode<synchronous>, transform_indices = @transform_2, window_bounds = array<i64: 24, 512>}, {pipeline_mode = #tpu.pipeline_mode<synchronous>, transform_indices = @transform_3, window_bounds = array<i64: 3, 512>}, {pipeline_mode = #tpu.pipeline_mode<synchronous>, transform_indices = @transform_4, window_bounds = array<i64: 512, 256>}, {pipeline_mode = #tpu.pipeline_mode<synchronous>, transform_indices = @transform_5, window_bounds = array<i64: 3, 256>}, {pipeline_mode = #tpu.pipeline_mode<synchronous>, transform_indices = @transform_6, window_bounds = array<i64: 256, 1>}, {pipeline_mode = #tpu.pipeline_mode<synchronous>, transform_indices = @transform_7, window_bounds = array<i64: 1, 1>}, {transform_indices = @transform_8, window_bounds = array<i64: 16, 1>}]} {
    %c0 = arith.constant 0 : index
    %c0_0 = arith.constant 0 : index
    %0 = vector.load %arg1[%c0, %c0_0] : memref<16x16xf32, #tpu.memory_space<vmem>>, vector<16x16xf32>
    %c0_1 = arith.constant 0 : index
    %c0_2 = arith.constant 0 : index
    %1 = vector.load %arg10[%c0_1, %c0_2] : memref<16x24xf32, #tpu.memory_space<vmem>>, vector<16x16xf32>
    tpu.vector_store %arg10[%c0_1, %c0_2], %0 {strides = array<i32>} : memref<16x24xf32, #tpu.memory_space<vmem>>, vector<16x16xf32>,
    %c0_3 = arith.constant 0 : index
    %c0_4 = arith.constant 0 : index
    %2 = vector.load %arg2[%c0_3, %c0_4] : memref<16x8xf32, #tpu.memory_space<vmem>>, vector<16x8xf32>
    %c0_5 = arith.constant 0 : index
    %c16 = arith.constant 16 : index
    %3 = vector.load %arg10[%c0_5, %c16] : memref<16x24xf32, #tpu.memory_space<vmem>>, vector<16x8xf32>
    tpu.vector_store %arg10[%c0_5, %c16], %2 {strides = array<i32>} : memref<16x24xf32, #tpu.memory_space<vmem>>, vector<16x8xf32>,
    %c0_6 = arith.constant 0 : index
    %c0_7 = arith.constant 0 : index
    %4 = vector.load %arg10[%c0_6, %c0_7] : memref<16x24xf32, #tpu.memory_space<vmem>>, vector<16x24xf32>
    %c0_8 = arith.constant 0 : index
    %c0_9 = arith.constant 0 : index
    %5 = vector.load %arg3[%c0_8, %c0_9] : memref<24x512xf32, #tpu.memory_space<vmem>>, vector<24x512xf32>
    %cst = arith.constant dense<0.000000e+00> : vector<16x512xf32>
    %6 = tpu.matmul %4, %5, %cst {dimension_numbers = #tpu.dot_dimension_numbers<[1], [0], [0], [1], [0, 0, 1, 1], [], []>} : vector<16x24xf32>, vector<24x512xf32>, vector<16x512xf32> -> vector<16x512xf32>
    %c0_10 = arith.constant 0 : index
    %c0_11 = arith.constant 0 : index
    %7 = vector.load %arg4[%c0_10, %c0_11] : memref<3x512xf32, #tpu.memory_space<vmem>>, vector<1x512xf32>
    %8 = vector.broadcast %7 : vector<1x512xf32> to vector<16x512xf32>
    %9 = arith.addf %6, %8 : vector<16x512xf32>
    %c1 = arith.constant 1 : index
    %c0_12 = arith.constant 0 : index
    %10 = vector.load %arg4[%c1, %c0_12] : memref<3x512xf32, #tpu.memory_space<vmem>>, vector<1x512xf32>
    %c2 = arith.constant 2 : index
    %c0_13 = arith.constant 0 : index
    %11 = vector.load %arg4[%c2, %c0_13] : memref<3x512xf32, #tpu.memory_space<vmem>>, vector<1x512xf32>
    %cst_14 = arith.constant dense<0.000000e+00> : vector<16xf32>
    %12 = vector.multi_reduction <add>, %9, %cst_14 [1] : vector<16x512xf32> to vector<16xf32>
    %13 = vector.shape_cast %12 : vector<16xf32> to vector<16x1xf32>
    %cst_15 = arith.constant 0.001953125 : f32
    %14 = vector.broadcast %cst_15 : f32 to vector<16x1xf32>
    %15 = arith.mulf %13, %14 : vector<16x1xf32>
    %16 = arith.mulf %9, %9 : vector<16x512xf32>
    %cst_16 = arith.constant dense<0.000000e+00> : vector<16xf32>
    %17 = vector.multi_reduction <add>, %16, %cst_16 [1] : vector<16x512xf32> to vector<16xf32>
    %18 = vector.shape_cast %17 : vector<16xf32> to vector<16x1xf32>
    %cst_17 = arith.constant 0.001953125 : f32
    %19 = vector.broadcast %cst_17 : f32 to vector<16x1xf32>
    %20 = arith.mulf %18, %19 : vector<16x1xf32>
    %21 = arith.mulf %15, %15 : vector<16x1xf32>
    %22 = arith.subf %20, %21 : vector<16x1xf32>
    %cst_18 = arith.constant 9.99999974E-6 : f32
    %23 = vector.broadcast %cst_18 : f32 to vector<16x1xf32>
    %24 = arith.addf %22, %23 : vector<16x1xf32>
    %25 = math.rsqrt %24 : vector<16x1xf32>
    %26 = vector.broadcast %10 : vector<1x512xf32> to vector<16x512xf32>
    %27 = vector.broadcast %25 : vector<16x1xf32> to vector<16x512xf32>
    %28 = arith.mulf %26, %27 : vector<16x512xf32>
    %29 = vector.broadcast %15 : vector<16x1xf32> to vector<16x512xf32>
    %30 = arith.subf %9, %29 : vector<16x512xf32>
    %31 = arith.mulf %30, %28 : vector<16x512xf32>
    %32 = vector.broadcast %11 : vector<1x512xf32> to vector<16x512xf32>
    %33 = arith.addf %31, %32 : vector<16x512xf32>
    %cst_19 = arith.constant 0.000000e+00 : f32
    %34 = vector.broadcast %cst_19 : f32 to vector<16x512xf32>
    %35 = arith.maximumf %33, %34 : vector<16x512xf32>
    %36 = arith.truncf %35 : vector<16x512xf32> to vector<16x512xbf16>
    %c0_20 = arith.constant 0 : index
    %c0_21 = arith.constant 0 : index
    %37 = vector.load %arg5[%c0_20, %c0_21] : memref<512x256xbf16, #tpu.memory_space<vmem>>, vector<512x256xbf16>
    %cst_22 = arith.constant dense<0.000000e+00> : vector<16x256xf32>
    %38 = tpu.matmul %36, %37, %cst_22 {dimension_numbers = #tpu.dot_dimension_numbers<[1], [0], [0], [1], [0, 0, 1, 1], [], []>} : vector<16x512xbf16>, vector<512x256xbf16>, vector<16x256xf32> -> vector<16x256xf32>
    %c0_23 = arith.constant 0 : index
    %c0_24 = arith.constant 0 : index
    %39 = vector.load %arg6[%c0_23, %c0_24] : memref<3x256xf32, #tpu.memory_space<vmem>>, vector<1x256xf32>
    %40 = vector.broadcast %39 : vector<1x256xf32> to vector<16x256xf32>
    %41 = arith.addf %38, %40 : vector<16x256xf32>
    %c1_25 = arith.constant 1 : index
    %c0_26 = arith.constant 0 : index
    %42 = vector.load %arg6[%c1_25, %c0_26] : memref<3x256xf32, #tpu.memory_space<vmem>>, vector<1x256xf32>
    %c2_27 = arith.constant 2 : index
    %c0_28 = arith.constant 0 : index
    %43 = vector.load %arg6[%c2_27, %c0_28] : memref<3x256xf32, #tpu.memory_space<vmem>>, vector<1x256xf32>
    %cst_29 = arith.constant dense<0.000000e+00> : vector<16xf32>
    %44 = vector.multi_reduction <add>, %41, %cst_29 [1] : vector<16x256xf32> to vector<16xf32>
    %45 = vector.shape_cast %44 : vector<16xf32> to vector<16x1xf32>
    %cst_30 = arith.constant 3.906250e-03 : f32
    %46 = vector.broadcast %cst_30 : f32 to vector<16x1xf32>
    %47 = arith.mulf %45, %46 : vector<16x1xf32>
    %48 = arith.mulf %41, %41 : vector<16x256xf32>
    %cst_31 = arith.constant dense<0.000000e+00> : vector<16xf32>
    %49 = vector.multi_reduction <add>, %48, %cst_31 [1] : vector<16x256xf32> to vector<16xf32>
    %50 = vector.shape_cast %49 : vector<16xf32> to vector<16x1xf32>
    %cst_32 = arith.constant 3.906250e-03 : f32
    %51 = vector.broadcast %cst_32 : f32 to vector<16x1xf32>
    %52 = arith.mulf %50, %51 : vector<16x1xf32>
    %53 = arith.mulf %47, %47 : vector<16x1xf32>
    %54 = arith.subf %52, %53 : vector<16x1xf32>
    %cst_33 = arith.constant 9.99999974E-6 : f32
    %55 = vector.broadcast %cst_33 : f32 to vector<16x1xf32>
    %56 = arith.addf %54, %55 : vector<16x1xf32>
    %57 = math.rsqrt %56 : vector<16x1xf32>
    %58 = vector.broadcast %42 : vector<1x256xf32> to vector<16x256xf32>
    %59 = vector.broadcast %57 : vector<16x1xf32> to vector<16x256xf32>
    %60 = arith.mulf %58, %59 : vector<16x256xf32>
    %61 = vector.broadcast %47 : vector<16x1xf32> to vector<16x256xf32>
    %62 = arith.subf %41, %61 : vector<16x256xf32>
    %63 = arith.mulf %62, %60 : vector<16x256xf32>
    %64 = vector.broadcast %43 : vector<1x256xf32> to vector<16x256xf32>
    %65 = arith.addf %63, %64 : vector<16x256xf32>
    %cst_34 = arith.constant 0.000000e+00 : f32
    %66 = vector.broadcast %cst_34 : f32 to vector<16x256xf32>
    %67 = arith.maximumf %65, %66 : vector<16x256xf32>
    %c0_35 = arith.constant 0 : index
    %c0_36 = arith.constant 0 : index
    %68 = vector.load %arg7[%c0_35, %c0_36] : memref<256x1xf32, #tpu.memory_space<vmem>>, vector<256x1xf32>
    %cst_37 = arith.constant dense<0.000000e+00> : vector<16x1xf32>
    %69 = tpu.matmul %67, %68, %cst_37 {dimension_numbers = #tpu.dot_dimension_numbers<[1], [0], [0], [1], [0, 0, 1, 1], [], []>} : vector<16x256xf32>, vector<256x1xf32>, vector<16x1xf32> -> vector<16x1xf32>
    %c0_38 = arith.constant 0 : index
    %c0_39 = arith.constant 0 : index
    %70 = vector.load %arg8[%c0_38, %c0_39] : memref<1x1xf32, #tpu.memory_space<vmem>>, vector<1x1xf32>
    %71 = vector.broadcast %70 : vector<1x1xf32> to vector<16x1xf32>
    %72 = arith.addf %69, %71 : vector<16x1xf32>
    %c0_40 = arith.constant 0 : index
    %c0_41 = arith.constant 0 : index
    %73 = vector.load %arg9[%c0_40, %c0_41] : memref<16x1xf32, #tpu.memory_space<vmem>>, vector<16x1xf32>
    tpu.vector_store %arg9[%c0_40, %c0_41], %72 {strides = array<i32>} : memref<16x1xf32, #tpu.memory_space<vmem>>, vector<16x1xf32>,
    return
  }
  func.func @transform_0(%arg0: i32) -> (i32, i32) {
    %c0_i32 = arith.constant 0 : i32
    %c0_i32_0 = arith.constant 0 : i32
    return %arg0, %c0_i32 : i32, i32
  }
  func.func @transform_1(%arg0: i32) -> (i32, i32) {
    %c0_i32 = arith.constant 0 : i32
    %c0_i32_0 = arith.constant 0 : i32
    return %arg0, %c0_i32 : i32, i32
  }
  func.func @transform_2(%arg0: i32) -> (i32, i32) {
    %c0_i32 = arith.constant 0 : i32
    %c0_i32_0 = arith.constant 0 : i32
    %c0_i32_1 = arith.constant 0 : i32
    return %c0_i32, %c0_i32_0 : i32, i32
  }
  func.func @transform_3(%arg0: i32) -> (i32, i32) {
    %c0_i32 = arith.constant 0 : i32
    %c0_i32_0 = arith.constant 0 : i32
    %c0_i32_1 = arith.constant 0 : i32
    return %c0_i32, %c0_i32_0 : i32, i32
  }
  func.func @transform_4(%arg0: i32) -> (i32, i32) {
    %c0_i32 = arith.constant 0 : i32
    %c0_i32_0 = arith.constant 0 : i32
    %c0_i32_1 = arith.constant 0 : i32
    return %c0_i32, %c0_i32_0 : i32, i32
  }
  func.func @transform_5(%arg0: i32) -> (i32, i32) {
    %c0_i32 = arith.constant 0 : i32
    %c0_i32_0 = arith.constant 0 : i32
    %c0_i32_1 = arith.constant 0 : i32
    return %c0_i32, %c0_i32_0 : i32, i32
  }
  func.func @transform_6(%arg0: i32) -> (i32, i32) {
    %c0_i32 = arith.constant 0 : i32
    %c0_i32_0 = arith.constant 0 : i32
    %c0_i32_1 = arith.constant 0 : i32
    return %c0_i32, %c0_i32_0 : i32, i32
  }
  func.func @transform_7(%arg0: i32) -> (i32, i32) {
    %c0_i32 = arith.constant 0 : i32
    %c0_i32_0 = arith.constant 0 : i32
    %c0_i32_1 = arith.constant 0 : i32
    return %c0_i32, %c0_i32_0 : i32, i32
  }
  func.func @transform_8(%arg0: i32) -> (i32, i32) {
    %c0_i32 = arith.constant 0 : i32
    %c0_i32_0 = arith.constant 0 : i32
    return %arg0, %c0_i32 : i32, i32
  }
}

</mosaic_0001>

<bundles_post_ra>
// kernel: tpu_custom_call.1
= control target key start
LH: loop header
LB: loop body
LE: loop exit
PB: predicated region body
PF: predicated region fallthrough
CT: control target
= control target key end

     0   :  { %s1691_s0 = inlined_call_operand.vmem [shape: f32[16,16], index: 0, kind: input, shape index: {}]   ;;  %s1692_s1 = inlined_call_operand.vmem [shape: f32[16,8], index: 1, kind: input, shape index: {}]   ;;  %s1693_s2 = inlined_call_operand.vmem [shape: f32[24,512], index: 2, kind: input, shape index: {}]   ;;  %s1694_s3 = inlined_call_operand.vmem [shape: f32[3,512], index: 3, kind: input, shape index: {}]   ;;  %s1695_s4 = inlined_call_operand.hbm [shape: bf16[512,256], index: 4, kind: input, shape index: {}]   ;;  %s1696_s5 = inlined_call_operand.vmem [shape: f32[3,256], index: 5, kind: input, shape index: {}]   ;;  %s1697_s6 = inlined_call_operand.vmem [shape: f32[256,1], index: 6, kind: input, shape index: {}]   ;;  %s1698_s7 = inlined_call_operand.<no memory space> [shape: f32[1,1], index: 7, kind: input, shape index: {}]   ;;  %s1699_s8 = inlined_call_operand.vmem [shape: f32[16,1], index: 8, kind: output, shape index: {}]  }
   0x1   :  { %v13_v0 = vstv %s1698_s7 }
   0x2   :  { %14 = vst [vmem:[#allocation3] sm:$0x1] %v13_v0 }
   0x3   :  { %15 = vsyncpa [#allocation5], 0  ;;  %s1360_s29 = smov [#allocation4]   ;;  %s1336_s11 = scalar_lea.hbm %s1695_s4, 8192 }
   0x4   :  { %s29_s30 = sshll.u32 %s1360_s29, 4  ;;  %p1337_p0 = scmp.ne.s32.totalorder %s1695_s4, %s1336_s11  ;;  %s30_s30 = int_to_ptr.vmem [resolvable:$true] %s29_s30 }
   0x5   :  { %p1340_p1 = scmp.lt.u32.totalorder %s1336_s11, %s1695_s4 }
   0x7   :  { %p1342_p2 = pnand %p1340_p1, %p1337_p0 }
   0x9   :  { %1345 = shalt.err (!%p1342_p2)
}
   0xa   :  { %s1346_s7 = scalar_lea.vmem %s30_s30, 8192  ;;  %p1351_p4 = scmp.lt.s32.totalorder %s30_s30, %s30_s30 }
   0xb   :  { %p1347_p3 = scmp.ne.s32.totalorder %s30_s30, %s1346_s7  ;;  %p1352_p5 = scmp.lt.s32.totalorder %s1346_s7, %s1346_s7 }
   0xd   :  { %p1353_p6 = por %p1352_p5, %p1351_p4 }
   0xf   :  { %p1354_p7 = pnand %p1353_p6, %p1347_p3 }
  0x11   :  { %1357 = shalt.err (!%p1354_p7)
}
  0x12   :  { %s1361_s16 = smov 128   ;;  %s1362_s17 = smov 8  }
  0x13   :  { %35 = dma.hbm_to_vmem [thread:$0]  %s1695_s4, 8192, %s30_s30, [#allocation5], %s1361_s16, %s1361_s16, %s1362_s17  }
  0x14   :  { %1358 = dma.done.wait [#allocation5], 8192  }
  0x15   :  { %1359 = vsyncadd [#allocation5], 4294959104  ;;  %v1363_v1 = vmov 0.0   ;;  %vm47_vm0 = vcmask 130048   ;;  %v50_v2 = vld [vmem:[%s1692_s1] sm:$0xff]  ;;  %s1364_s24 = smov 16   ;;  %v79_v54 = vlaneseq }
  0x16   :  { %170 = vmatprep.mubr.f32.mxu0 %v1363_v1  ;;  %v45_v3 = vld [vmem:[%s1691_s0] sm:$0xff]  ;;  %54 = vrot.lane.b32.xlu0 %v50_v2, %s1364_s24  ;;  %v66_v4 = vld [vmem:[%s1693_s2 + $0x8] sm:$0xff]  ;;  %v68_v13 = vld [vmem:[%s1693_s2 + $0x18] sm:$0xff]  ;;  %vm60_vm1 = vcmask 195712   ;;  %vm99_vm2 = vcmask 195584   ;;  %vm1060_vm3 = vcmask 7168  }
  0x17   :  { %48 = vst.msk [vmem:[#allocation2] sm:$0xff] %vm47_vm0, %v45_v3  ;;  %v70_v5 = vld [vmem:[%s1693_s2 + $0x28] sm:$0xff]  ;;  %v65_v6 = vld [vmem:[%s1693_s2] sm:$0xff]  ;;  %v72_v14 = vld [vmem:[%s1693_s2 + $0x38] sm:$0xff]  ;;  %v80_v55 = vshrl.u32 %v79_v54, 7 }
  0x18   :  { %v51_v7 = vld [vmem:[%s1692_s1 + $0x8] sm:$0xff]  ;;  %v1179_v8 = vpack.c.bf16 %v70_v5, %v66_v4  ;;  %v69_v9 = vld [vmem:[%s1693_s2 + $0x20] sm:$0xff]  ;;  %v1183_v16 = vpack.c.bf16 %v72_v14, %v68_v13  ;;  %v67_v18 = vld [vmem:[%s1693_s2 + $0x10] sm:$0xff] }
  0x19   :  { %v46_v10 = vld [vmem:[%s1691_s0 + $0x8] sm:$0xff]  ;;  %v1181_v11 = vpack.c.bf16 %v69_v9, %v65_v6  ;;  %v73_v15 = vld [vmem:[%s1693_s2 + $0x40] sm:$0xff]  ;;  %v71_v19 = vld [vmem:[%s1693_s2 + $0x30] sm:$0xff]  ;;  %v1473_v56 = vsub.s32 0, %v80_v55  ;;  %v1475_v57 = vsub.s32 1, %v80_v55  ;;  %v1482_v63 = vsub.s32 2, %v80_v55 }
  0x1a   :  { %49 = vst.msk [vmem:[#allocation2 + $0x8] sm:$0xff] %vm47_vm0, %v46_v10  ;;  %v74_v12 = vld [vmem:[%s1693_s2 + $0x48] sm:$0xff]  ;;  %1180 = vmatprep.subr.bf16.mxu0 %v1179_v8  ;;  %56 = vrot.lane.b32.xlu0 %v51_v7, %s1364_s24  ;;  %v1185_v21 = vpack.c.bf16 %v71_v19, %v67_v18  ;;  %v76_v23 = vld [vmem:[%s1693_s2 + $0x58] sm:$0xff]  ;;  %v75_v24 = vld [vmem:[%s1693_s2 + $0x50] sm:$0xff]  ;;  %v1488_v2 = vsub.s32 3, %v80_v55 }
  0x1b   :  { %1182 = vmatpush1.bf16.msra.mxu0 %v1181_v11  ;;  %v1232_v26 = vld [vmem:[#allocation4 + $0x4] ss:$8 sps:$4 sm:$0xff]   ;;  %v1234_v27 = vld [vmem:[#allocation4 + $0x100] ss:$8 sps:$4 sm:$0xff]   ;;  %v1238_v30 = vld [vmem:[#allocation4 + $0x14] ss:$8 sps:$4 sm:$0xff]  }
  0x1c   :  { %110 = vmatprep.subr.mxu0 %v74_v12  ;;  %v1236_v28 = vld [vmem:[#allocation4 + $0x104] ss:$8 sps:$4 sm:$0xff]   ;;  %v1237_v29 = vld [vmem:[#allocation4] ss:$8 sps:$4 sm:$0xff]   ;;  %786 = vmatprep.subr.bf16.mxu1 %v1232_v26  ;;  %v1242_v31 = vld [vmem:[#allocation4 + $0x114] ss:$8 sps:$4 sm:$0xff]  }
  0x1d   :  { %787 = vmatpush1.bf16.msra.mxu1 %v1237_v29  ;;  %v1240_v32 = vld [vmem:[#allocation4 + $0x110] ss:$8 sps:$4 sm:$0xff]   ;;  %v1244_v34 = vld [vmem:[#allocation4 + $0x24] ss:$8 sps:$4 sm:$0xff]   ;;  %v1246_v36 = vld [vmem:[#allocation4 + $0x120] ss:$8 sps:$4 sm:$0xff]  }
  0x1e   :  { %v1243_v33 = vld [vmem:[#allocation4 + $0x10] ss:$8 sps:$4 sm:$0xff]   ;;  %788 = vmatprep.subr.bf16.mxu1 %v1238_v30  ;;  %v1248_v35 = vld [vmem:[#allocation4 + $0x124] ss:$8 sps:$4 sm:$0xff]   ;;  %v1249_v37 = vld [vmem:[#allocation4 + $0x20] ss:$8 sps:$4 sm:$0xff]  }
  0x1f   :  { %111 = vmatpush1.msra.mxu0 %v73_v15  ;;  %v1250_v38 = vld [vmem:[#allocation4 + $0x34] ss:$8 sps:$4 sm:$0xff]   ;;  %v1252_v40 = vld [vmem:[#allocation4 + $0x130] ss:$8 sps:$4 sm:$0xff]   ;;  %v1256_v42 = vld [vmem:[#allocation4 + $0x44] ss:$8 sps:$4 sm:$0xff]  }
  0x20   :  { %1184 = vmatprep.subr.bf16.mxu0 %v1183_v16  ;;  %v1254_v39 = vld [vmem:[#allocation4 + $0x134] ss:$8 sps:$4 sm:$0xff]   ;;  %v1255_v41 = vld [vmem:[#allocation4 + $0x30] ss:$8 sps:$4 sm:$0xff]   ;;  %v1260_v43 = vld [vmem:[#allocation4 + $0x144] ss:$8 sps:$4 sm:$0xff]  }
  0x21   :  { %789 = vmatpush1.bf16.msra.mxu1 %v1243_v33  ;;  %v1258_v44 = vld [vmem:[#allocation4 + $0x140] ss:$8 sps:$4 sm:$0xff]   ;;  %v1262_v46 = vld [vmem:[#allocation4 + $0x54] ss:$8 sps:$4 sm:$0xff]   ;;  %v1264_v48 = vld [vmem:[#allocation4 + $0x150] ss:$8 sps:$4 sm:$0xff]  }
  0x22   :  { %790 = vmatprep.subr.bf16.mxu1 %v1244_v34  ;;  %v1261_v45 = vld [vmem:[#allocation4 + $0x40] ss:$8 sps:$4 sm:$0xff]   ;;  %v1266_v47 = vld [vmem:[#allocation4 + $0x154] ss:$8 sps:$4 sm:$0xff]   ;;  %v1267_v49 = vld [vmem:[#allocation4 + $0x50] ss:$8 sps:$4 sm:$0xff]  }
  0x23   :  { %v1268_v50 = vld [vmem:[#allocation4 + $0x64] ss:$8 sps:$4 sm:$0xff]   ;;  %v1270_v52 = vld [vmem:[#allocation4 + $0x160] ss:$8 sps:$4 sm:$0xff]   ;;  %v1300_v54 = vld [vmem:[#allocation4 + $0x1b0] ss:$8 sps:$4 sm:$0xff]  }
  0x24   :  { %v1272_v51 = vld [vmem:[#allocation4 + $0x164] ss:$8 sps:$4 sm:$0xff]   ;;  %v1273_v53 = vld [vmem:[#allocation4 + $0x60] ss:$8 sps:$4 sm:$0xff]   ;;  %v1302_v55 = vld [vmem:[#allocation4 + $0x1b4] ss:$8 sps:$4 sm:$0xff]  }
  0x25   :  { %791 = vmatpush1.bf16.msra.mxu1 %v1249_v37  ;;  %v77_v58 = vld [vmem:[%s1694_s3] ss:$4 sm:$0xf] }
  0x26   :  { %792 = vmatprep.subr.bf16.mxu1 %v1250_v38  ;;  %v82_v59 = vrot.slane %v77_v58, %v1473_v56  ;;  %v86_v60 = vrot.slane %v77_v58, %v1475_v57  ;;  %v90_v5 = vrot.slane %v77_v58, %v1482_v63  ;;  %v94_v8 = vrot.slane %v77_v58, %v1488_v2  ;;  %v1274_v37 = vld [vmem:[#allocation4 + $0x74] ss:$8 sps:$4 sm:$0xff]   ;;  %v1303_v58 = vld [vmem:[#allocation4 + $0xb0] ss:$8 sps:$4 sm:$0xff]  }
  0x27   :  { %v1278_v38 = vld [vmem:[#allocation4 + $0x174] ss:$8 sps:$4 sm:$0xff]  }
  0x29   :  { %793 = vmatpush1.bf16.msra.mxu1 %v1255_v41  ;;  %v1280_v41 = vld [vmem:[#allocation4 + $0x84] ss:$8 sps:$4 sm:$0xff]  }
  0x2a   :  { %794 = vmatprep.subr.bf16.mxu1 %v1256_v42  ;;  %v1284_v42 = vld [vmem:[#allocation4 + $0x184] ss:$8 sps:$4 sm:$0xff]  }
  0x2d   :  { %795 = vmatpush1.bf16.msra.mxu1 %v1261_v45  ;;  %v1286_v45 = vld [vmem:[#allocation4 + $0x94] ss:$8 sps:$4 sm:$0xff]  }
  0x2e   :  { %796 = vmatprep.subr.bf16.mxu1 %v1262_v46  ;;  %v1290_v46 = vld [vmem:[#allocation4 + $0x194] ss:$8 sps:$4 sm:$0xff]  }
  0x31   :  { %797 = vmatpush1.bf16.msra.mxu1 %v1267_v49  ;;  %v1292_v49 = vld [vmem:[#allocation4 + $0xa4] ss:$8 sps:$4 sm:$0xff]  }
  0x32   :  { %798 = vmatprep.subr.bf16.mxu1 %v1268_v50  ;;  %v1296_v50 = vld [vmem:[#allocation4 + $0x1a4] ss:$8 sps:$4 sm:$0xff]  }
  0x35   :  { %799 = vmatpush1.bf16.msra.mxu1 %v1273_v53  ;;  %v1298_v53 = vld [vmem:[#allocation4 + $0xb4] ss:$8 sps:$4 sm:$0xff]  }
  0x36   :  { %800 = vmatprep.subr.bf16.mxu1 %v1274_v37 }
  0x88   :  { %v55_v17 = vpop.permute.xlu0 %54 }
  0x89   :  { %61 = vst.msk [vmem:[#allocation2] sm:$0xff] %vm60_vm1, %v55_v17 }
  0x8c   :  { %v57_v20 = vpop.permute.xlu0 %56 }
  0x8d   :  { %62 = vst.msk [vmem:[#allocation2 + $0x8] sm:$0xff] %vm60_vm1, %v57_v20 }
  0x90   :  { %v63_v22 = vld [vmem:[#allocation2] sm:$0xff] }
  0x91   :  { %1068 = vmatmul.mubr.msk.f32.vlgmr.msra.gmra.mrb[0].mxu0 %vm99_vm2, %v63_v22 }
  0x92   :  { %1186 = vmatpush1.bf16.msra.mxu0 %v1185_v21  ;;  %176 = vmatprep.mubr.f32.mxu0 %v1363_v1 }
  0x93   :  { %187 = vmatprep.subr.mxu0 %v76_v23 }
  0x94   :  { %v64_v25 = vld [vmem:[#allocation2 + $0x8] sm:$0xff] }
  0x95   :  { %1069 = vmatmul.mubr.msk.f32.gmra.mrb[2].mxu0 %vm99_vm2, %v64_v25 }
  0x96   :  { %188 = vmatpush1.msra.mxu0 %v75_v24  ;;  %247 = vmatprep.mubr.f32.mxu0 %v1363_v1 }
  0x97   :  { %829 = vmatprep.subr.bf16.mxu0 %v1236_v28 }
  0x99   :  { %1070 = vmatmul.mubr.msk.f32.vlgmr.msra.gmra.mrb[4].mxu0 %vm99_vm2, %v63_v22 }
  0x9a   :  { %253 = vmatprep.mubr.f32.mxu0 %v1363_v1  ;;  %830 = vmatpush1.bf16.msra.mxu0 %v1234_v27 }
  0x9b   :  { %831 = vmatprep.subr.bf16.mxu0 %v1242_v31 }
  0x9d   :  { %1071 = vmatmul.mubr.msk.f32.gmra.mrb[6].mxu0 %vm99_vm2, %v64_v25 }
  0x9e   :  { %832 = vmatpush1.bf16.msra.mxu0 %v1240_v32 }
  0x9f   :  { %833 = vmatprep.subr.bf16.mxu0 %v1248_v35 }
  0xa2   :  { %834 = vmatpush1.bf16.msra.mxu0 %v1246_v36 }
  0xa3   :  { %835 = vmatprep.subr.bf16.mxu0 %v1254_v39  ;;  %v1276_v39 = vld [vmem:[#allocation4 + $0x170] ss:$8 sps:$4 sm:$0xff]  }
  0xa6   :  { %836 = vmatpush1.bf16.msra.mxu0 %v1252_v40  ;;  %v1279_v40 = vld [vmem:[#allocation4 + $0x70] ss:$8 sps:$4 sm:$0xff]  }
  0xa7   :  { %837 = vmatprep.subr.bf16.mxu0 %v1260_v43  ;;  %801 = vmatpush1.bf16.msra.mxu1 %v1279_v40  ;;  %v1282_v43 = vld [vmem:[#allocation4 + $0x180] ss:$8 sps:$4 sm:$0xff]  }
  0xa8   :  { %802 = vmatprep.subr.bf16.mxu1 %v1280_v41 }
  0xaa   :  { %838 = vmatpush1.bf16.msra.mxu0 %v1258_v44  ;;  %v1285_v44 = vld [vmem:[#allocation4 + $0x80] ss:$8 sps:$4 sm:$0xff]  }
  0xab   :  { %839 = vmatprep.subr.bf16.mxu0 %v1266_v47  ;;  %803 = vmatpush1.bf16.msra.mxu1 %v1285_v44  ;;  %v1288_v47 = vld [vmem:[#allocation4 + $0x190] ss:$8 sps:$4 sm:$0xff]  }
  0xac   :  { %804 = vmatprep.subr.bf16.mxu1 %v1286_v45 }
  0xae   :  { %840 = vmatpush1.bf16.msra.mxu0 %v1264_v48  ;;  %v1291_v48 = vld [vmem:[#allocation4 + $0x90] ss:$8 sps:$4 sm:$0xff]  }
  0xaf   :  { %841 = vmatprep.subr.bf16.mxu0 %v1272_v51  ;;  %805 = vmatpush1.bf16.msra.mxu1 %v1291_v48  ;;  %v1294_v51 = vld [vmem:[#allocation4 + $0x1a0] ss:$8 sps:$4 sm:$0xff]  }
  0xb0   :  { %806 = vmatprep.subr.bf16.mxu1 %v1292_v49 }
  0xb2   :  { %842 = vmatpush1.bf16.msra.mxu0 %v1270_v52  ;;  %v1297_v52 = vld [vmem:[#allocation4 + $0xa0] ss:$8 sps:$4 sm:$0xff]  }
  0xb3   :  { %843 = vmatprep.subr.bf16.mxu0 %v1278_v38  ;;  %807 = vmatpush1.bf16.msra.mxu1 %v1297_v52 }
  0xb4   :  { %808 = vmatprep.subr.bf16.mxu1 %v1298_v53 }
  0xb6   :  { %844 = vmatpush1.bf16.msra.mxu0 %v1276_v39 }
  0xb7   :  { %845 = vmatprep.subr.bf16.mxu0 %v1284_v42  ;;  %809 = vmatpush1.bf16.msra.mxu1 %v1303_v58 }
  0xba   :  { %846 = vmatpush1.bf16.msra.mxu0 %v1282_v43  ;;  %v1073_v43 = vld [vmem:[%s1694_s3 + $0x2] ss:$4 sm:$0xf] }
  0xbb   :  { %847 = vmatprep.subr.bf16.mxu0 %v1290_v46  ;;  %v365_v53 = vrot.slane %v1073_v43, %v1488_v2 }
  0xbe   :  { %848 = vmatpush1.bf16.msra.mxu0 %v1288_v47 }
  0xbf   :  { %849 = vmatprep.subr.bf16.mxu0 %v1296_v50 }
  0xc2   :  { %850 = vmatpush1.bf16.msra.mxu0 %v1294_v51  ;;  %v357_v51 = vrot.slane %v1073_v43, %v1475_v57 }
  0xc3   :  { %851 = vmatprep.subr.bf16.mxu0 %v1302_v55  ;;  %v361_v55 = vrot.slane %v1073_v43, %v1482_v63 }
  0xc6   :  { %852 = vmatpush1.bf16.msra.mxu0 %v1300_v54 }
 0x164   :  { %v172_v61 = vpop.f32.mrb[0].mxu0 }
 0x165   :  { %v174_v62 = vpop.f32.mrb[1].mxu0  ;;  %v1484_v0 = vadd.f32 %v172_v61, %v82_v59  ;;  %v1306_v61 = vld [vmem:[#allocation4 + $0x1c0] ss:$8 sps:$4 sm:$0xff]  }
 0x166   :  { %v1486_v1 = vadd.f32 %v174_v62, %v86_v60  ;;  %v1309_v62 = vld [vmem:[#allocation4 + $0xc0] ss:$8 sps:$4 sm:$0xff]  }
 0x167   :  { %v276_v6 = vmul.f32 %v1484_v0, %v1484_v0 }
 0x168   :  { %v178_v3 = vpop.f32.mrb[2].mxu0  ;;  %v277_v7 = vmul.f32 %v1486_v1, %v1486_v1  ;;  %v264_v14 = vadd.f32 %v1486_v1, %v1484_v0 }
 0x169   :  { %v180_v4 = vpop.f32.mrb[3].mxu0  ;;  %v1496_v9 = vadd.f32 %v178_v3, %v82_v59  ;;  %v1304_v59 = vld [vmem:[#allocation4 + $0xc4] ss:$8 sps:$4 sm:$0xff]   ;;  %v1310_v3 = vld [vmem:[#allocation4 + $0xd4] ss:$8 sps:$4 sm:$0xff]  }
 0x16a   :  { %v1498_v10 = vadd.f32 %v180_v4, %v86_v60  ;;  %v284_v16 = vadd.f32 %v277_v7, %v276_v6  ;;  %v1308_v60 = vld [vmem:[#allocation4 + $0x1c4] ss:$8 sps:$4 sm:$0xff]   ;;  %810 = vmatprep.subr.bf16.mxu1 %v1304_v59  ;;  %v1314_v4 = vld [vmem:[#allocation4 + $0x1d4] ss:$8 sps:$4 sm:$0xff]   ;;  %v1315_v6 = vld [vmem:[#allocation4 + $0xd0] ss:$8 sps:$4 sm:$0xff]   ;;  %v353_v59 = vrot.slane %v1073_v43, %v1473_v56 }
 0x16b   :  { %v280_v17 = vmul.f32 %v1496_v9, %v1496_v9  ;;  %853 = vmatprep.subr.bf16.mxu0 %v1308_v60  ;;  %811 = vmatpush1.bf16.msra.mxu1 %v1309_v62  ;;  %v1316_v7 = vld [vmem:[#allocation4 + $0xe4] ss:$8 sps:$4 sm:$0xff]  }
 0x16c   :  { %v249_v11 = vpop.f32.mrb[4].mxu0  ;;  %v281_v18 = vmul.f32 %v1498_v10, %v1498_v10  ;;  %v269_v23 = vadd.f32 %v1498_v10, %v1496_v9  ;;  %854 = vmatpush1.bf16.msra.mxu0 %v1306_v61  ;;  %812 = vmatprep.subr.bf16.mxu1 %v1310_v3 }
 0x16d   :  { %v1500_v12 = vadd.f32 %v249_v11, %v90_v5  ;;  %v251_v13 = vpop.f32.mrb[5].mxu0  ;;  %855 = vmatprep.subr.bf16.mxu0 %v1314_v4  ;;  %v1318_v11 = vld [vmem:[#allocation4 + $0x1e0] ss:$8 sps:$4 sm:$0xff]  }
 0x16e   :  { %v1504_v15 = vadd.f32 %v251_v13, %v94_v8  ;;  %v289_v32 = vadd.f32 %v281_v18, %v280_v17  ;;  %v1321_v13 = vld [vmem:[#allocation4 + $0xe0] ss:$8 sps:$4 sm:$0xff]   ;;  %v1324_v17 = vld [vmem:[#allocation4 + $0x1f0] ss:$8 sps:$4 sm:$0xff]  }
 0x16f   :  { %v278_v19 = vmul.f32 %v1500_v12, %v1500_v12  ;;  %v265_v20 = vadd.f32 %v264_v14, %v1500_v12  ;;  %813 = vmatpush1.bf16.msra.mxu1 %v1315_v6  ;;  %v1322_v14 = vld [vmem:[#allocation4 + $0xf4] ss:$8 sps:$4 sm:$0xff]   ;;  %v1327_v18 = vld [vmem:[#allocation4 + $0xf0] ss:$8 sps:$4 sm:$0xff]  }
 0x170   :  { %v255_v21 = vpop.f32.mrb[6].mxu0  ;;  %v279_v22 = vmul.f32 %v1504_v15, %v1504_v15  ;;  %814 = vmatprep.subr.bf16.mxu1 %v1316_v7 }
 0x171   :  { %v1517_v24 = vadd.f32 %v255_v21, %v90_v5  ;;  %v257_v25 = vpop.f32.mrb[7].mxu0  ;;  %v266_v26 = vadd.f32 %v265_v20, %v1504_v15  ;;  %v285_v27 = vadd.f32 %v284_v16, %v278_v19  ;;  %v1312_v5 = vld [vmem:[#allocation4 + $0x1d0] ss:$8 sps:$4 sm:$0xff]   ;;  %v1326_v16 = vld [vmem:[#allocation4 + $0x1f4] ss:$8 sps:$4 sm:$0xff]  }
 0x172   :  { %v1520_v28 = vadd.f32 %v257_v25, %v94_v8  ;;  %v1320_v8 = vld [vmem:[#allocation4 + $0x1e4] ss:$8 sps:$4 sm:$0xff]   ;;  %856 = vmatpush1.bf16.msra.mxu0 %v1312_v5 }
 0x173   :  { %v282_v29 = vmul.f32 %v1517_v24, %v1517_v24  ;;  %267 = vadd.xlane.f32.xlu1 %v266_v26  ;;  %v286_v30 = vadd.f32 %v285_v27, %v279_v22  ;;  %v270_v31 = vadd.f32 %v269_v23, %v1517_v24  ;;  %857 = vmatprep.subr.bf16.mxu0 %v1320_v8 }
 0x174   :  { %v283_v34 = vmul.f32 %v1520_v28, %v1520_v28  ;;  %815 = vmatpush1.bf16.msra.mxu1 %v1321_v13 }
 0x175   :  { %287 = vadd.xlane.f32.xlu0 %v286_v30  ;;  %v271_v33 = vadd.f32 %v270_v31, %v1520_v28  ;;  %v290_v35 = vadd.f32 %v289_v32, %v282_v29  ;;  %816 = vmatprep.subr.bf16.mxu1 %v1322_v14 }
 0x176   :  { %858 = vmatpush1.bf16.msra.mxu0 %v1318_v11 }
 0x177   :  { %272 = vadd.xlane.f32.xlu1 %v271_v33  ;;  %v291_v36 = vadd.f32 %v290_v35, %v283_v34  ;;  %859 = vmatprep.subr.bf16.mxu0 %v1326_v16  ;;  %v1072_v34 = vld [vmem:[%s1694_s3 + $0x1] ss:$4 sm:$0xf] }
 0x178   :  { %817 = vmatpush1.bf16.msra.mxu1 %v1327_v18  ;;  %v312_v37 = vrot.slane %v1072_v34, %v1475_v57  ;;  %v316_v38 = vrot.slane %v1072_v34, %v1482_v63  ;;  %v308_v39 = vrot.slane %v1072_v34, %v1473_v56 }
 0x17a   :  { %860 = vmatpush1.bf16.msra.mxu0 %v1324_v17 }
 0x17b   :  { %292 = vadd.xlane.f32.xlu1 %v291_v36  ;;  %v320_v36 = vrot.slane %v1072_v34, %v1488_v2 }
 0x200   :  { %v268_v19 = vpop.xlane.xlu1 %267 }
 0x201   :  { %v274_v20 = vmul.f32 0.001953125, %v268_v19 }
 0x202   :  { %v288_v21 = vpop.xlane.xlu0 %287 }
 0x203   :  { %v294_v22 = vmul.f32 0.001953125, %v288_v21  ;;  %v296_v23 = vmul.f32 %v274_v20, %v274_v20  ;;  %v334_v46 = vsub.f32 %v1486_v1, %v274_v20  ;;  %v336_v47 = vsub.f32 %v1504_v15, %v274_v20 }
 0x204   :  { %v273_v25 = vpop.xlane.xlu1 %272  ;;  %v335_v48 = vsub.f32 %v1500_v12, %v274_v20  ;;  %v333_v49 = vsub.f32 %v1484_v0, %v274_v20 }
 0x205   :  { %v298_v26 = vsub.f32 %v294_v22, %v296_v23  ;;  %v275_v27 = vmul.f32 0.001953125, %v273_v25 }
 0x207   :  { %v300_v29 = vadd.f32 1e-05, %v298_v26  ;;  %v297_v31 = vmul.f32 %v275_v27, %v275_v27  ;;  %v338_v15 = vsub.f32 %v1498_v10, %v275_v27  ;;  %v340_v12 = vsub.f32 %v1520_v28, %v275_v27 }
 0x208   :  { %v293_v30 = vpop.xlane.xlu1 %292  ;;  %v339_v0 = vsub.f32 %v1517_v24, %v275_v27  ;;  %v337_v3 = vsub.f32 %v1496_v9, %v275_v27 }
 0x209   :  { %1328 = vrsqrt.f32 %v300_v29  ;;  %v295_v32 = vmul.f32 0.001953125, %v293_v30  ;;  %v962_v29 = vld [vmem:[%s1697_s6 + $0x80] sm:$0xff]  ;;  %v963_v30 = vld [vmem:[%s1697_s6 + $0x88] sm:$0xff] }
 0x20b   :  { %v299_v33 = vsub.f32 %v295_v32, %v297_v31  ;;  %v946_v31 = vld [vmem:[%s1697_s6] sm:$0xff]  ;;  %v1187_v32 = vpack.c.bf16 %v963_v30, %v962_v29 }
 0x20c   :  { %v974_v30 = vld [vmem:[%s1697_s6 + $0xe0] sm:$0xff] }
 0x20d   :  { %v301_v35 = vadd.f32 1e-05, %v299_v33  ;;  %v947_v33 = vld [vmem:[%s1697_s6 + $0x8] sm:$0xff]  ;;  %1188 = vmatprep.subr.bf16.mxu1 %v1187_v32  ;;  %v958_v32 = vld [vmem:[%s1697_s6 + $0x60] sm:$0xff] }
 0x20e   :  { %v1189_v34 = vpack.c.bf16 %v947_v33, %v946_v31  ;;  %v975_v31 = vld [vmem:[%s1697_s6 + $0xe8] sm:$0xff] }
 0x20f   :  { %1330 = vrsqrt.f32 %v301_v35  ;;  %v454_v35 = vld [vmem:[%s1696_s5] ss:$4 sm:$0x3]  ;;  %v1211_v33 = vpack.c.bf16 %v975_v31, %v974_v30 }
 0x213   :  { %v1329_v40 = vpop.eup %1328 }
 0x214   :  { %v326_v41 = vmul.f32 %v1329_v40, %v312_v37  ;;  %v328_v42 = vmul.f32 %v1329_v40, %v320_v36  ;;  %v325_v44 = vmul.f32 %v1329_v40, %v308_v39  ;;  %v327_v45 = vmul.f32 %v1329_v40, %v316_v38 }
 0x216   :  { %v342_v50 = vmul.f32 %v334_v46, %v326_v41  ;;  %v344_v52 = vmul.f32 %v336_v47, %v328_v42  ;;  %v341_v58 = vmul.f32 %v333_v49, %v325_v44  ;;  %v343_v60 = vmul.f32 %v335_v48, %v327_v45 }
 0x218   :  { %v371_v5 = vadd.f32 %v357_v51, %v342_v50  ;;  %v373_v63 = vadd.f32 %v365_v53, %v344_v52  ;;  %v370_v8 = vadd.f32 %v353_v59, %v341_v58  ;;  %v372_v13 = vadd.f32 %v361_v55, %v343_v60 }
 0x219   :  { %v1331_v54 = vpop.eup %1330 }
 0x21a   :  { %v330_v1 = vmul.f32 %v1331_v54, %v312_v37  ;;  %v332_v61 = vmul.f32 %v1331_v54, %v320_v36  ;;  %v329_v62 = vmul.f32 %v1331_v54, %v308_v39  ;;  %v331_v4 = vmul.f32 %v1331_v54, %v316_v38 }
 0x21b   :  { %v379_v18 = vmax.f32 %v371_v5, 0.0  ;;  %v381_v19 = vmax.f32 %v373_v63, 0.0  ;;  %v378_v20 = vmax.f32 %v370_v8, 0.0  ;;  %v380_v9 = vmax.f32 %v372_v13, 0.0  ;;  %v966_v5 = vld [vmem:[%s1697_s6 + $0xa0] sm:$0xff]  ;;  %v951_v8 = vld [vmem:[%s1697_s6 + $0x28] sm:$0xff] }
 0x21c   :  { %v346_v2 = vmul.f32 %v338_v15, %v330_v1  ;;  %v348_v6 = vmul.f32 %v340_v12, %v332_v61  ;;  %v345_v7 = vmul.f32 %v337_v3, %v329_v62  ;;  %v347_v11 = vmul.f32 %v339_v0, %v331_v4  ;;  %v964_v12 = vld [vmem:[%s1697_s6 + $0x90] sm:$0xff]  ;;  %v965_v0 = vld [vmem:[%s1697_s6 + $0x98] sm:$0xff] }
 0x21d   :  { %v459_v36 = vrot.slane %v454_v35, %v1473_v56  ;;  %v463_v37 = vrot.slane %v454_v35, %v1475_v57  ;;  %v1191_v62 = vpack.c.bf16 %v965_v0, %v964_v12  ;;  %v948_v3 = vld [vmem:[%s1697_s6 + $0x10] sm:$0xff]  ;;  %v949_v4 = vld [vmem:[%s1697_s6 + $0x18] sm:$0xff] }
 0x21e   :  { %v375_v14 = vadd.f32 %v357_v51, %v346_v2  ;;  %v377_v16 = vadd.f32 %v365_v53, %v348_v6  ;;  %v374_v10 = vadd.f32 %v353_v59, %v345_v7  ;;  %v376_v17 = vadd.f32 %v361_v55, %v347_v11  ;;  %v967_v6 = vld [vmem:[%s1697_s6 + $0xa8] sm:$0xff]  ;;  %v950_v7 = vld [vmem:[%s1697_s6 + $0x20] sm:$0xff]  ;;  %v968_v13 = vld [vmem:[%s1697_s6 + $0xb0] sm:$0xff] }
 0x21f   :  { %v1193_v2 = vpack.c.bf16 %v949_v4, %v948_v3  ;;  %v1195_v63 = vpack.c.bf16 %v967_v6, %v966_v5  ;;  %v1197_v11 = vpack.c.bf16 %v951_v8, %v950_v7  ;;  %v976_v35 = vld [vmem:[%s1697_s6 + $0xf0] sm:$0xff] }
 0x220   :  { %v383_v28 = vmax.f32 %v375_v14, 0.0  ;;  %v385_v24 = vmax.f32 %v377_v16, 0.0  ;;  %v382_v21 = vmax.f32 %v374_v10, 0.0  ;;  %v384_v22 = vmax.f32 %v376_v17, 0.0  ;;  %v969_v14 = vld [vmem:[%s1697_s6 + $0xb8] sm:$0xff]  ;;  %v952_v10 = vld [vmem:[%s1697_s6 + $0x30] sm:$0xff] }
 0x221   :  { %v1199_v16 = vpack.c.bf16 %v969_v14, %v968_v13  ;;  %v953_v17 = vld [vmem:[%s1697_s6 + $0x38] sm:$0xff] }
 0x222   :  { %v387_v23 = vpack.c.bf16 %v383_v28, %v379_v18  ;;  %v389_v25 = vpack.c.bf16 %v385_v24, %v381_v19  ;;  %v386_v26 = vpack.c.bf16 %v382_v21, %v378_v20  ;;  %v388_v27 = vpack.c.bf16 %v384_v22, %v380_v9  ;;  %v970_v28 = vld [vmem:[%s1697_s6 + $0xc0] sm:$0xff]  ;;  %v971_v19 = vld [vmem:[%s1697_s6 + $0xc8] sm:$0xff]  ;;  %v972_v22 = vld [vmem:[%s1697_s6 + $0xd0] sm:$0xff] }
 0x223   :  { %v1201_v18 = vpack.c.bf16 %v953_v17, %v952_v10  ;;  %v1203_v24 = vpack.c.bf16 %v971_v19, %v970_v28  ;;  %v954_v20 = vld [vmem:[%s1697_s6 + $0x40] sm:$0xff]  ;;  %v955_v21 = vld [vmem:[%s1697_s6 + $0x48] sm:$0xff] }
 0x224   :  { %818 = vmatprep.mubr.bf16.mxu1 %v387_v23  ;;  %861 = vmatprep.mubr.bf16.mxu0 %v389_v25  ;;  %v1205_v9 = vpack.c.bf16 %v955_v21, %v954_v20  ;;  %v973_v23 = vld [vmem:[%s1697_s6 + $0xd8] sm:$0xff] }
 0x225   :  { %819 = vmatmul.mubr.bf16.vlgmr.msra.gmra.mrb[0].mxu1 %v386_v26  ;;  %862 = vmatmul.mubr.bf16.vlgmr.msra.gmra.mrb[8].mxu0 %v388_v27  ;;  %v1207_v25 = vpack.c.bf16 %v973_v23, %v972_v22  ;;  %v956_v26 = vld [vmem:[%s1697_s6 + $0x50] sm:$0xff]  ;;  %v957_v27 = vld [vmem:[%s1697_s6 + $0x58] sm:$0xff] }
 0x226   :  { %1190 = vmatpush3.bf16.msra.mxu1 %v1189_v34  ;;  %v1209_v29 = vpack.c.bf16 %v957_v27, %v956_v26  ;;  %v959_v34 = vld [vmem:[%s1697_s6 + $0x68] sm:$0xff] }
 0x227   :  { %1192 = vmatprep.subr.bf16.mxu1 %v1191_v62 }
 0x22a   :  { %1194 = vmatpush3.bf16.msra.mxu1 %v1193_v2 }
 0x22b   :  { %1196 = vmatprep.subr.bf16.mxu1 %v1195_v63 }
 0x22e   :  { %1198 = vmatpush3.bf16.msra.mxu1 %v1197_v11 }
 0x22f   :  { %1200 = vmatprep.subr.bf16.mxu1 %v1199_v16 }
 0x232   :  { %1202 = vmatpush3.bf16.msra.mxu1 %v1201_v18 }
 0x233   :  { %1204 = vmatprep.subr.bf16.mxu1 %v1203_v24 }
 0x236   :  { %1206 = vmatpush3.bf16.msra.mxu1 %v1205_v9  ;;  %v1140_v9 = vld [vmem:[#allocation3] ss:$0 sm:$0xff] }
 0x237   :  { %1208 = vmatprep.subr.bf16.mxu1 %v1207_v25 }
 0x23a   :  { %1210 = vmatpush3.bf16.msra.mxu1 %v1209_v29 }
 0x23b   :  { %1212 = vmatprep.subr.bf16.mxu1 %v1211_v33 }
 0x2f8   :  { %v820_v38 = vpop.f32.mrb[0].mxu1  ;;  %v863_v39 = vpop.f32.mrb[8].mxu0 }
 0x2f9   :  { %v821_v40 = vadd.f32 %v820_v38, %v459_v36  ;;  %v822_v41 = vpop.f32.mrb[1].mxu1  ;;  %v865_v42 = vpop.f32.mrb[9].mxu0 }
 0x2fa   :  { %v823_v43 = vadd.f32 %v822_v41, %v463_v37  ;;  %v824_v44 = vpop.f32.mrb[2].mxu1  ;;  %v867_v45 = vpop.f32.mrb[10].mxu0 }
 0x2fb   :  { %v1567_v46 = vadd.f32 %v863_v39, %v821_v40  ;;  %v825_v47 = vadd.f32 %v824_v44, %v459_v36  ;;  %v826_v48 = vpop.f32.mrb[3].mxu1  ;;  %v869_v49 = vpop.f32.mrb[11].mxu0  ;;  %v977_v36 = vld [vmem:[%s1697_s6 + $0xf8] sm:$0xff]  ;;  %v960_v39 = vld [vmem:[%s1697_s6 + $0x70] sm:$0xff] }
 0x2fc   :  { %v1569_v50 = vadd.f32 %v865_v42, %v823_v43  ;;  %v827_v51 = vadd.f32 %v826_v48, %v463_v37  ;;  %v1213_v37 = vpack.c.bf16 %v959_v34, %v958_v32  ;;  %v1215_v38 = vpack.c.bf16 %v977_v36, %v976_v35  ;;  %v961_v40 = vld [vmem:[%s1697_s6 + $0x78] sm:$0xff] }
 0x2fd   :  { %v1571_v52 = vadd.f32 %v867_v45, %v825_v47  ;;  %v884_v55 = vmul.f32 %v1567_v46, %v1567_v46  ;;  %v1217_v41 = vpack.c.bf16 %v961_v40, %v960_v39 }
 0x2fe   :  { %v1573_v53 = vadd.f32 %v869_v49, %v827_v51  ;;  %v876_v54 = vadd.f32 %v1569_v50, %v1567_v46  ;;  %v885_v58 = vmul.f32 %v1569_v50, %v1569_v50  ;;  %1214 = vmatpush3.bf16.msra.mxu1 %v1213_v37 }
 0x2ff   :  { %v886_v1 = vmul.f32 %v1571_v52, %v1571_v52  ;;  %1216 = vmatprep.subr.bf16.mxu1 %v1215_v38 }
 0x300   :  { %877 = vadd.xlane.f32.xlu1 %v876_v54  ;;  %v888_v59 = vadd.f32 %v885_v58, %v884_v55  ;;  %v879_v60 = vadd.f32 %v1573_v53, %v1571_v52  ;;  %v887_v15 = vmul.f32 %v1573_v53, %v1573_v53 }
 0x302   :  { %v891_v61 = vadd.f32 %v887_v15, %v886_v1  ;;  %1218 = vmatpush3.bf16.msra.mxu1 %v1217_v41  ;;  %v1138_v1 = vld [vmem:[%s1696_s5 + $0x1] ss:$4 sm:$0x3] }
 0x303   :  { %v908_v12 = vrot.slane %v1138_v1, %v1473_v56  ;;  %v912_v0 = vrot.slane %v1138_v1, %v1475_v57 }
 0x304   :  { %889 = vadd.xlane.f32.xlu1 %v888_v59 }
 0x308   :  { %880 = vadd.xlane.f32.xlu1 %v879_v60 }
 0x30c   :  { %892 = vadd.xlane.f32.xlu1 %v891_v61  ;;  %v1139_v61 = vld [vmem:[%s1696_s5 + $0x2] ss:$4 sm:$0x3] }
 0x30d   :  { %v931_v3 = vrot.slane %v1139_v61, %v1473_v56  ;;  %v935_v4 = vrot.slane %v1139_v61, %v1475_v57 }
 0x38d   :  { %v878_v42 = vpop.xlane.xlu1 %877 }
 0x38e   :  { %v882_v43 = vmul.f32 0.00390625, %v878_v42 }
 0x390   :  { %v896_v45 = vmul.f32 %v882_v43, %v882_v43  ;;  %v919_v2 = vsub.f32 %v1567_v46, %v882_v43  ;;  %v920_v5 = vsub.f32 %v1569_v50, %v882_v43 }
 0x391   :  { %v890_v44 = vpop.xlane.xlu1 %889 }
 0x392   :  { %v894_v47 = vmul.f32 0.00390625, %v890_v44 }
 0x394   :  { %v898_v48 = vsub.f32 %v894_v47, %v896_v45 }
 0x395   :  { %v881_v49 = vpop.xlane.xlu1 %880 }
 0x396   :  { %v900_v51 = vadd.f32 1e-05, %v898_v48  ;;  %v883_v54 = vmul.f32 0.00390625, %v881_v49 }
 0x398   :  { %1332 = vrsqrt.f32 %v900_v51  ;;  %v897_v58 = vmul.f32 %v883_v54, %v883_v54  ;;  %v921_v17 = vsub.f32 %v1571_v52, %v883_v54  ;;  %v922_v18 = vsub.f32 %v1573_v53, %v883_v54 }
 0x399   :  { %v893_v55 = vpop.xlane.xlu1 %892 }
 0x39a   :  { %v895_v59 = vmul.f32 0.00390625, %v893_v55 }
 0x39c   :  { %v899_v60 = vsub.f32 %v895_v59, %v897_v58 }
 0x39e   :  { %v901_v15 = vadd.f32 1e-05, %v899_v60 }
 0x3a0   :  { %1334 = vrsqrt.f32 %v901_v15 }
 0x3a2   :  { %v1333_v62 = vpop.eup %1332 }
 0x3a3   :  { %v916_v6 = vmul.f32 %v1333_v62, %v912_v0  ;;  %v915_v63 = vmul.f32 %v1333_v62, %v908_v12 }
 0x3a5   :  { %v924_v7 = vmul.f32 %v920_v5, %v916_v6  ;;  %v923_v8 = vmul.f32 %v919_v2, %v915_v63 }
 0x3a7   :  { %v939_v11 = vadd.f32 %v935_v4, %v924_v7  ;;  %v938_v13 = vadd.f32 %v931_v3, %v923_v8 }
 0x3a9   :  { %v943_v14 = vmax.f32 %v939_v11, 0.0  ;;  %v942_v16 = vmax.f32 %v938_v13, 0.0 }
 0x3aa   :  { %v1335_v10 = vpop.eup %1334 }
 0x3ab   :  { %1049 = vmatprep.mubr.f32.mxu1 %v943_v14  ;;  %v918_v56 = vmul.f32 %v1335_v10, %v912_v0  ;;  %v917_v57 = vmul.f32 %v1335_v10, %v908_v12 }
 0x3ac   :  { %1050 = vmatmul.mubr.f32.vlgmr.msra.gmra.mrb[4].mxu1 %v942_v16 }
 0x3ad   :  { %v926_v46 = vmul.f32 %v922_v18, %v918_v56  ;;  %v925_v28 = vmul.f32 %v921_v17, %v917_v57 }
 0x3af   :  { %v941_v50 = vadd.f32 %v935_v4, %v926_v46  ;;  %v940_v19 = vadd.f32 %v931_v3, %v925_v28 }
 0x3b1   :  { %v945_v24 = vmax.f32 %v941_v50, 0.0  ;;  %v944_v20 = vmax.f32 %v940_v19, 0.0 }
 0x3b3   :  { %1054 = vmatprep.mubr.f32.mxu1 %v945_v24 }
 0x3b4   :  { %1055 = vmatmul.mubr.f32.gmra.mrb[6].mxu1 %v944_v20 }
 0x47f   :  { %v1173_v21 = vpop.f32.mrb[4].mxu1 }
 0x480   :  { %v1174_v22 = vpop.f32.mrb[5].mxu1 }
 0x481   :  { %v1175_v23 = vadd.f32 %v1174_v22, %v1173_v21 }
 0x483   :  { %v1052_v52 = vadd.f32 %v1175_v23, %v1140_v9 }
 0x485   :  { %1061 = vst.msk [vmem:[%s1699_s8] sm:$0xff] %vm1060_vm3, %v1052_v52 }
 0x487   :  { %v1176_v53 = vpop.f32.mrb[6].mxu1 }
 0x488   :  { %v1177_v25 = vpop.f32.mrb[7].mxu1 }
 0x489   :  { %v1178_v26 = vadd.f32 %v1177_v25, %v1176_v53 }
 0x48b   :  { %v1057_v27 = vadd.f32 %v1178_v26, %v1140_v9 }
 0x48d   :  { %1062 = vst.msk [vmem:[%s1699_s8 + $0x8] sm:$0xff] %vm1060_vm3, %v1057_v27 }
 0x48e   :  { %1067 = vsyncpa [#allocation5], 1 }

</bundles_post_ra>
